<compile_context>
chip_gen: v5e
topology: v5e:2x2
jax: 0.10.0
libtpu: 0.0.40
codegen_flags: <defaults>
</compile_context>

<pallas_src>
import functools

import jax
import jax.numpy as jnp
from jax import lax
from jax.experimental import pallas as pl
from jax.experimental.pallas import tpu as pltpu


VMEM_LIMIT = 48 * 1024 * 1024  # below v7x's 64 MiB physical, above 32 MiB scoped default


def _tile(dim, target, align):
    """Largest multiple of `align` that divides `dim` and is <= target, else full dim."""
    if dim <= target:
        return dim
    t = (target // align) * align
    while t >= align:
        if dim % t == 0:
            return t
        t -= align
    return dim


# ----------------------------- tiled matmul kernel -----------------------------

def _matmul_kernel(*refs, act, has_mix, has_pre, has_bias, has_omul):
    it = iter(refs)
    x_ref = next(it)
    w_ref = next(it)
    xx_ref = next(it) if has_mix else None
    maa_ref = next(it) if has_mix else None
    pre_ref = next(it) if has_pre else None
    bias_ref = next(it) if has_bias else None
    omul_ref = next(it) if has_omul else None
    o_ref = next(it)
    acc_ref = next(it)

    k = pl.program_id(2)

    @pl.when(k == 0)
    def _():
        acc_ref[...] = jnp.zeros_like(acc_ref)

    x = x_ref[...]
    if has_mix:
        x = x + xx_ref[...] * maa_ref[...]
    if has_pre:
        x = x * pre_ref[...]
    acc_ref[...] += jnp.dot(x.astype(jnp.bfloat16), w_ref[...],
                            preferred_element_type=jnp.float32)

    @pl.when(k == pl.num_programs(2) - 1)
    def _():
        y = acc_ref[...]
        if has_bias:
            y = y + bias_ref[...]
        if act == "tanh":
            y = jnp.tanh(y)
        elif act == "relu_sq":            # torch.relu(.) ** 2
            y = jnp.square(jnp.maximum(y, 0.0))
        elif act == "sigmoid":
            y = jax.nn.sigmoid(y)
        elif act == "silu":
            y = y * jax.nn.sigmoid(y)
        elif act == "expexp":             # exp(-exp(.))
            y = jnp.exp(-jnp.exp(y))
        if has_omul:
            y = y * omul_ref[...]
        o_ref[...] = y.astype(o_ref.dtype)


def matmul(x, w, *, act=None, mix=None, pre_mul=None, bias=None, out_mul=None,
           tm=256, tn=256, tk=512):
    """Tiled (M,K)@(K,N) matmul, bf16 operands / f32 accumulate, fused epilogues.

    mix     : (xx, maa) -> x := x + xx * maa   (token-shift mix prologue)
    pre_mul : elementwise multiplier of x (same shape as x)
    bias    : (N,) added before activation
    out_mul : (M, N) elementwise multiplier of the result
    """
    M, K = x.shape
    K2, N = w.shape
    assert K == K2
    tm = _tile(M, tm, 8)
    tn = _tile(N, tn, 128)
    tk = _tile(K, tk, 128)
    grid = (M // tm, N // tn, K // tk)

    has_mix = mix is not None
    has_pre = pre_mul is not None
    has_bias = bias is not None
    has_omul = out_mul is not None

    # bf16 the plain activation path in the wrapper; mixed/pre-multiplied inputs
    # stay f32 and are cast after the fused prologue inside the kernel.
    cast_x = not (has_mix or has_pre)
    operands = [x.astype(jnp.bfloat16) if cast_x else x.astype(jnp.float32),
                w.astype(jnp.bfloat16)]
    in_specs = [pl.BlockSpec((tm, tk), lambda i, j, k: (i, k)),
                pl.BlockSpec((tk, tn), lambda i, j, k: (k, j))]
    if has_mix:
        xx, maa = mix
        operands += [xx.astype(jnp.float32), jnp.reshape(maa, (1, K)).astype(jnp.float32)]
        in_specs += [pl.BlockSpec((tm, tk), lambda i, j, k: (i, k)),
                     pl.BlockSpec((1, tk), lambda i, j, k: (0, k))]
    if has_pre:
        operands += [pre_mul.astype(jnp.float32)]
        in_specs += [pl.BlockSpec((tm, tk), lambda i, j, k: (i, k))]
    if has_bias:
        operands += [jnp.reshape(bias, (1, N)).astype(jnp.float32)]
        in_specs += [pl.BlockSpec((1, tn), lambda i, j, k: (0, j))]
    if has_omul:
        operands += [out_mul.astype(jnp.float32)]
        in_specs += [pl.BlockSpec((tm, tn), lambda i, j, k: (i, j))]

    kernel = functools.partial(_matmul_kernel, act=act, has_mix=has_mix,
                               has_pre=has_pre, has_bias=has_bias, has_omul=has_omul)
    return pl.pallas_call(
        kernel,
        out_shape=jax.ShapeDtypeStruct((M, N), jnp.float32),
        grid=grid,
        in_specs=in_specs,
        out_specs=pl.BlockSpec((tm, tn), lambda i, j, k: (i, j)),
        scratch_shapes=[pltpu.VMEM((tm, tn), jnp.float32)],
        compiler_params=pltpu.CompilerParams(
            dimension_semantics=("parallel", "parallel", "arbitrary"),
            vmem_limit_bytes=VMEM_LIMIT),
    )(*operands)


# ----------------------------- layer/group norm -----------------------------

def _layernorm_kernel(x_ref, g_ref, b_ref, o_ref, *, eps):
    x = x_ref[...]
    mean = jnp.mean(x, axis=-1, keepdims=True)
    var = jnp.mean(jnp.square(x - mean), axis=-1, keepdims=True)
    o_ref[...] = (x - mean) * lax.rsqrt(var + eps) * g_ref[...] + b_ref[...]


def layernorm(x2d, gamma, beta, eps, tm=256):
    M, C = x2d.shape
    tm = _tile(M, tm, 8)
    return pl.pallas_call(
        functools.partial(_layernorm_kernel, eps=eps),
        out_shape=jax.ShapeDtypeStruct((M, C), jnp.float32),
        grid=(M // tm,),
        in_specs=[pl.BlockSpec((tm, C), lambda i: (i, 0)),
                  pl.BlockSpec((1, C), lambda i: (0, 0)),
                  pl.BlockSpec((1, C), lambda i: (0, 0))],
        out_specs=pl.BlockSpec((tm, C), lambda i: (i, 0)),
        compiler_params=pltpu.CompilerParams(
            dimension_semantics=("parallel",), vmem_limit_bytes=VMEM_LIMIT),
    )(x2d, gamma.reshape(1, C), beta.reshape(1, C))


def _groupnorm_kernel(x_ref, g_ref, b_ref, o_ref, *, eps, ngroups):
    tm, C = x_ref.shape
    n = C // ngroups
    x = x_ref[...].reshape(tm, ngroups, n)
    mean = jnp.mean(x, axis=-1, keepdims=True)
    var = jnp.mean(jnp.square(x - mean), axis=-1, keepdims=True)
    y = ((x - mean) * lax.rsqrt(var + eps)).reshape(tm, C)
    o_ref[...] = y * g_ref[...] + b_ref[...]


def groupnorm(x2d, gamma, beta, num_groups, eps, tm=256):
    """nn.GroupNorm semantics on (M, C) rows, lane-dense (C-last) single kernel."""
    M, C = x2d.shape
    tm = _tile(M, tm, 8)
    return pl.pallas_call(
        functools.partial(_groupnorm_kernel, eps=eps, ngroups=num_groups),
        out_shape=jax.ShapeDtypeStruct((M, C), jnp.float32),
        grid=(M // tm,),
        in_specs=[pl.BlockSpec((tm, C), lambda i: (i, 0)),
                  pl.BlockSpec((1, C), lambda i: (0, 0)),
                  pl.BlockSpec((1, C), lambda i: (0, 0))],
        out_specs=pl.BlockSpec((tm, C), lambda i: (i, 0)),
        compiler_params=pltpu.CompilerParams(
            dimension_semantics=("parallel",), vmem_limit_bytes=VMEM_LIMIT),
    )(x2d, gamma.reshape(1, C), beta.reshape(1, C))


# -------------------- fused 5-way data-dependent token-shift mix --------------------

def _mix5_kernel(x_ref, xx_ref, maa_x_ref, w1_ref, w2_ref, maa5_ref, o_ref, *, tm_extra):
    x = x_ref[...]                                                   # (tm, C) f32
    xx = xx_ref[...]
    xxx = (x + xx * maa_x_ref[...]).astype(jnp.bfloat16)
    tmp = jnp.tanh(jnp.dot(xxx, w1_ref[...],
                           preferred_element_type=jnp.float32))      # (tm, 5*TM)
    tmp = tmp.astype(jnp.bfloat16)
    w2 = w2_ref[...]                                                  # (5, TM, C) bf16
    maa5 = maa5_ref[...]                                              # (5, C) f32
    for i in range(5):
        m = jnp.dot(tmp[:, i * tm_extra:(i + 1) * tm_extra], w2[i],
                    preferred_element_type=jnp.float32)               # (tm, C)
        o_ref[i] = x + xx * (maa5[i] + m)


def mix5(x2, xx2, maa_x, w1, w2, maa5, tm=256):
    """Returns (5, BT, C) = x + xx*(maa_i + tanh((x+xx*maa_x)@w1)[:, i] @ w2[i])."""
    BT, C = x2.shape
    TM = w2.shape[1]
    tm = _tile(BT, tm, 8)
    return pl.pallas_call(
        functools.partial(_mix5_kernel, tm_extra=TM),
        out_shape=jax.ShapeDtypeStruct((5, BT, C), jnp.float32),
        grid=(BT // tm,),
        in_specs=[pl.BlockSpec((tm, C), lambda i: (i, 0)),
                  pl.BlockSpec((tm, C), lambda i: (i, 0)),
                  pl.BlockSpec((1, C), lambda i: (0, 0)),
                  pl.BlockSpec((C, 5 * TM), lambda i: (0, 0)),
                  pl.BlockSpec((5, TM, C), lambda i: (0, 0, 0)),
                  pl.BlockSpec((5, C), lambda i: (0, 0))],
        out_specs=pl.BlockSpec((5, tm, C), lambda i: (0, i, 0)),
        compiler_params=pltpu.CompilerParams(
            dimension_semantics=("parallel",), vmem_limit_bytes=VMEM_LIMIT),
    )(x2, xx2, maa_x.reshape(1, C), w1.astype(jnp.bfloat16),
      w2.astype(jnp.bfloat16), maa5.astype(jnp.float32))


# -------------------- fused bi-directional RWKV6 WKV recurrence --------------------

def _wkv_bi_kernel(rev_ref, r_ref, k_ref, v_ref, w_ref, u_ref, o_ref, bwd_ref):
    # r/k/v/w/o refs: (T, H, N) for one batch; u_ref: (H, N); rev_ref: SMEM (B, T)
    b = pl.program_id(0)
    T, H, N = r_ref.shape
    u = u_ref[...]                                                    # (H, N)

    def step(t_in, S):
        r = r_ref[t_in]                                               # (H, N)
        k = k_ref[t_in]
        v = v_ref[t_in]
        w = w_ref[t_in]
        kv = k[:, :, None] * v[:, None, :]                            # (H, N, N)
        out = jnp.sum((S + u[:, :, None] * kv) * r[:, :, None], axis=1)   # (H, N)
        return out, w[:, :, None] * S + kv

    # forward-in-time pass
    def fwd_body(t, S):
        out, S = step(t, S)
        o_ref[t] = out
        return S
    lax.fori_loop(0, T, fwd_body, jnp.zeros((H, N, N), jnp.float32))

    # time-reversed pass (input order given by rev_idx), stashed in VMEM scratch
    def bwd_body(t, S):
        s = rev_ref[b, t]
        out, S = step(s, S)
        bwd_ref[t] = out
        return S
    lax.fori_loop(0, T, bwd_body, jnp.zeros((H, N, N), jnp.float32))

    # un-reverse and combine:  o[t] += bwd[rev_idx[t]]
    def comb_body(t, carry):
        s = rev_ref[b, t]
        o_ref[t] = o_ref[t] + bwd_ref[s]
        return carry
    lax.fori_loop(0, T, comb_body, 0)


def wkv_bi(r, k, v, w, u, rev_idx):
    """Forward + time-reversed RWKV6 WKV, summed.  r/k/v/w: (B,T,H,N); u: (H,N)."""
    B, T, H, N = r.shape
    spec = pl.BlockSpec((None, T, H, N), lambda b, rev: (b, 0, 0, 0))
    u_spec = pl.BlockSpec((H, N), lambda b, rev: (0, 0))
    return pl.pallas_call(
        _wkv_bi_kernel,
        out_shape=jax.ShapeDtypeStruct((B, T, H, N), jnp.float32),
        grid_spec=pltpu.PrefetchScalarGridSpec(
            num_scalar_prefetch=1,
            grid=(B,),
            in_specs=[spec, spec, spec, spec, u_spec],
            out_specs=spec,
            scratch_shapes=[pltpu.VMEM((T, H, N), jnp.float32)]),
        compiler_params=pltpu.CompilerParams(
            dimension_semantics=("parallel",), vmem_limit_bytes=VMEM_LIMIT),
    )(rev_idx.astype(jnp.int32), r, k, v, w, u)


# ----------------------------- forward pass (glue) -----------------------------

def time_shift(x):
    # nn.ZeroPad2d((0, 0, 1, -1)) on (B, T, C): out[:, 0] = 0, out[:, t] = x[:, t-1]
    return jnp.pad(x, ((0, 0), (1, 0), (0, 0)))[:, :-1, :]


def cmix_forward(x, xx, p):
    """BiRWKV_CMix_x060.forward (token-shift mixes fused into the GEMM prologues)."""
    B, T, C = x.shape
    x2 = x.reshape(B * T, C)
    xx2 = xx.reshape(B * T, C)
    k = matmul(x2, p["W_key"], act="relu_sq", mix=(xx2, p["time_maa_k"]))
    r = matmul(x2, p["W_recept"], act="sigmoid", mix=(xx2, p["time_maa_r"]))
    out = matmul(k, p["W_value"], out_mul=r)          # sigmoid(recept) * value(k)
    return out.reshape(B, T, C)


def tmix_forward(x, xx, rev_idx, mask, p):
    """BiRWKV_Tmix_x060.forward (bi-directional WKV; see module TODO)."""
    B, T, C = x.shape
    H, N = p["n_head"], p["head_size"]
    D = H * N
    BT = B * T
    x2 = x.reshape(BT, C)
    xx2 = xx.reshape(BT, C)

    # ---- jit_func: five data-dependent token-shift mixes in one kernel ----
    mixed = mix5(x2, xx2, p["time_maa_x"], p["time_maa_w1"], p["time_maa_w2"],
                 p["maa_wkvrg"])                      # (5, BT, C): xw, xk, xv, xr, xg
    xw, xk, xv, xr, xg = mixed[0], mixed[1], mixed[2], mixed[3], mixed[4]

    r = matmul(xr, p["W_r"])
    k = matmul(xk, p["W_k"])
    v = matmul(xv, p["W_v"])
    g = matmul(xg, p["W_g"], act="silu")

    # w = exp(-exp(time_decay + tanh(xw @ w1) @ w2))  (bias + activation fused)
    w = matmul(matmul(xw, p["time_decay_w1"], act="tanh"),
               p["time_decay_w2"], bias=p["time_decay"], act="expexp")

    def to_bthn(a):           # pure reshape, no transpose
        return a.reshape(B, T, H, N)

    att = wkv_bi(to_bthn(r), to_bthn(k), to_bthn(v), to_bthn(w),
                 p["time_faaaa"], rev_idx)            # (B, T, H, N) fwd + bwd
    att = att.reshape(BT, D)

    # ---- jit_func_2 ----
    att = groupnorm(att, p["ln_x_g"], p["ln_x_b"], H, p["ln_x_eps"])
    out = matmul(att, p["W_o"], pre_mul=g).reshape(B, T, C)   # output(ln_x(att) * g)
    return out * mask[..., None]


def biblock_forward(x, rev_idx, mask, params):
    B, T, C = x.shape
    BT = B * T
    # layer_id != 0 -> no ln0 / pre_ffn branch
    h = layernorm(x.reshape(BT, C), params["ln1_g"], params["ln1_b"], 1e-5).reshape(B, T, C)
    hx = time_shift(h) - h
    x = x + tmix_forward(h, hx, rev_idx, mask, params["att"])
    h = layernorm(x.reshape(BT, C), params["ln2_g"], params["ln2_b"], 1e-5).reshape(B, T, C)
    hx = time_shift(h) - h
    x = x + cmix_forward(h, hx, params["ffn"])
    return x


# -------------------------- deterministic parameter init --------------------------

def init_params(key, *, n_embd, dim_att, dim_ffn, head_size, n_layer, layer_id,
                head_size_divisor):
    C = n_embd
    H = dim_att // head_size
    N = head_size
    TM = 32   # TIME_MIX_EXTRA_DIM   (n_embd != 4096)
    TD = 64   # TIME_DECAY_EXTRA_DIM (n_embd != 4096)
    r01 = layer_id / (n_layer - 1)
    r1a0 = 1.0 - layer_id / n_layer
    ddd = jnp.arange(C, dtype=jnp.float32) / C

    ks = jax.random.split(key, 16)

    def lin(k, fan_in, fan_out):
        # deterministic stand-in for nn.Linear weight, stored (in, out) in bf16
        w = jax.random.normal(k, (fan_in, fan_out), jnp.float32) * (fan_in ** -0.5)
        return w.astype(jnp.bfloat16)

    n = jnp.arange(dim_att, dtype=jnp.float32)
    decay_speed = -6.0 + 5.0 * jnp.power(n / (dim_att - 1), 0.7 + 1.3 * r01)
    zigzag = (((jnp.arange(dim_att) + 1) % 3) - 1).astype(jnp.float32) * 0.1
    faaaa = (r01 * (1.0 - n / (dim_att - 1)) + zigzag).reshape(H, N)

    maa_w = 1.0 - jnp.power(ddd, r1a0)
    maa_k = 1.0 - jnp.power(ddd, r1a0)
    maa_v = 1.0 - (jnp.power(ddd, r1a0) + 0.3 * r01)
    maa_r = 1.0 - jnp.power(ddd, 0.5 * r1a0)
    maa_g = 1.0 - jnp.power(ddd, 0.5 * r1a0)

    att = dict(
        n_head=H, head_size=N,
        time_maa_x=1.0 - jnp.power(ddd, r1a0),
        maa_wkvrg=jnp.stack([maa_w, maa_k, maa_v, maa_r, maa_g], axis=0),   # (5, C)
        time_maa_w1=jax.random.uniform(ks[0], (C, TM * 5), jnp.float32, -1e-4, 1e-4),
        time_maa_w2=jax.random.uniform(ks[1], (5, TM, C), jnp.float32, -1e-4, 1e-4),
        time_decay=decay_speed,
        time_decay_w1=jax.random.uniform(ks[2], (C, TD), jnp.float32, -1e-4, 1e-4).astype(jnp.bfloat16),
        time_decay_w2=jax.random.uniform(ks[3], (TD, dim_att), jnp.float32, -1e-4, 1e-4).astype(jnp.bfloat16),
        time_faaaa=faaaa,
        W_r=lin(ks[4], C, dim_att),
        W_k=lin(ks[5], C, dim_att),
        W_v=lin(ks[6], C, dim_att),
        W_g=lin(ks[7], C, dim_att),
        W_o=lin(ks[8], dim_att, C),
        ln_x_g=jnp.ones((dim_att,), jnp.float32),
        ln_x_b=jnp.zeros((dim_att,), jnp.float32),
        ln_x_eps=1e-5 * head_size_divisor ** 2,
    )
    ffn = dict(
        time_maa_k=1.0 - jnp.power(ddd, r1a0),
        time_maa_r=1.0 - jnp.power(ddd, r1a0),
        W_key=lin(ks[9], C, dim_ffn),
        W_recept=lin(ks[10], C, C),
        W_value=lin(ks[11], dim_ffn, C),
    )
    return dict(
        att=att, ffn=ffn,
        ln1_g=jnp.ones((C,), jnp.float32), ln1_b=jnp.zeros((C,), jnp.float32),
        ln2_g=jnp.ones((C,), jnp.float32), ln2_b=jnp.zeros((C,), jnp.float32),
    )


# -------------------------- main --------------------------

if __name__ == "__main__":
    B, T = 2, 8
    n_embd = 32
    dim_att = 32
    dim_ffn = 64
    head_size = 8          # args.head_size_a -> n_head = 4
    n_layer = 4
    layer_id = 1
    head_size_divisor = 8

    key = jax.random.PRNGKey(0)
    kx, kp = jax.random.split(key)
    x = jax.random.normal(kx, (B, T, n_embd), jnp.float32)
    rev_idx = jnp.broadcast_to(
        jnp.arange(T - 1, -1, -1, dtype=jnp.int32)[None, :], (B, T))
    mask = jnp.ones((B, T), jnp.float32)

    params = init_params(kp, n_embd=n_embd, dim_att=dim_att, dim_ffn=dim_ffn,
                         head_size=head_size, n_layer=n_layer, layer_id=layer_id,
                         head_size_divisor=head_size_divisor)

    out = biblock_forward(x, rev_idx, mask, params)
    out = jax.block_until_ready(out)
    assert out.shape == (B, T, n_embd) and out.dtype == jnp.float32
    assert bool(jnp.all(jnp.isfinite(out)))
    print("KERNEL_OK")
</pallas_src>

<mosaic_0001>
module attributes {stable_mosaic.version = 11 : i64} {
  func.func @_layernorm_kernel(%arg0: i32, %arg1: memref<16x32xf32, #tpu.memory_space<vmem>>, %arg2: memref<1x32xf32, #tpu.memory_space<vmem>>, %arg3: memref<1x32xf32, #tpu.memory_space<vmem>>, %arg4: memref<16x32xf32, #tpu.memory_space<vmem>>) attributes {dimension_semantics = [#tpu.dimension_semantics<parallel>], iteration_bounds = array<i64: 1>, scalar_prefetch = 0 : i64, scratch_operands = 0 : i64, tpu.core_type = #tpu.core_type<tc>, window_params = [{transform_indices = @transform_0, window_bounds = array<i64: 16, 32>}, {pipeline_mode = #tpu.pipeline_mode<synchronous>, transform_indices = @transform_1, window_bounds = array<i64: 1, 32>}, {pipeline_mode = #tpu.pipeline_mode<synchronous>, transform_indices = @transform_2, window_bounds = array<i64: 1, 32>}, {transform_indices = @transform_3, window_bounds = array<i64: 16, 32>}]} {
    %c0 = arith.constant 0 : index
    %c0_0 = arith.constant 0 : index
    %0 = vector.load %arg1[%c0, %c0_0] : memref<16x32xf32, #tpu.memory_space<vmem>>, vector<16x32xf32>
    %cst = arith.constant dense<0.000000e+00> : vector<16xf32>
    %1 = vector.multi_reduction <add>, %0, %cst [1] : vector<16x32xf32> to vector<16xf32>
    %2 = vector.shape_cast %1 : vector<16xf32> to vector<16x1xf32>
    %cst_1 = arith.constant 3.200000e+01 : f32
    %3 = vector.broadcast %cst_1 : f32 to vector<16x1xf32>
    %4 = arith.divf %2, %3 : vector<16x1xf32>
    %5 = vector.broadcast %4 : vector<16x1xf32> to vector<16x32xf32>
    %6 = arith.subf %0, %5 : vector<16x32xf32>
    %7 = arith.mulf %6, %6 : vector<16x32xf32>
    %cst_2 = arith.constant dense<0.000000e+00> : vector<16xf32>
    %8 = vector.multi_reduction <add>, %7, %cst_2 [1] : vector<16x32xf32> to vector<16xf32>
    %9 = vector.shape_cast %8 : vector<16xf32> to vector<16x1xf32>
    %cst_3 = arith.constant 3.200000e+01 : f32
    %10 = vector.broadcast %cst_3 : f32 to vector<16x1xf32>
    %11 = arith.divf %9, %10 : vector<16x1xf32>
    %12 = vector.broadcast %4 : vector<16x1xf32> to vector<16x32xf32>
    %13 = arith.subf %0, %12 : vector<16x32xf32>
    %cst_4 = arith.constant 9.99999974E-6 : f32
    %14 = vector.broadcast %cst_4 : f32 to vector<16x1xf32>
    %15 = arith.addf %11, %14 : vector<16x1xf32>
    %16 = math.rsqrt %15 : vector<16x1xf32>
    %17 = vector.broadcast %16 : vector<16x1xf32> to vector<16x32xf32>
    %18 = arith.mulf %13, %17 : vector<16x32xf32>
    %c0_5 = arith.constant 0 : index
    %c0_6 = arith.constant 0 : index
    %19 = vector.load %arg2[%c0_5, %c0_6] : memref<1x32xf32, #tpu.memory_space<vmem>>, vector<1x32xf32>
    %20 = vector.broadcast %19 : vector<1x32xf32> to vector<16x32xf32>
    %21 = arith.mulf %18, %20 : vector<16x32xf32>
    %c0_7 = arith.constant 0 : index
    %c0_8 = arith.constant 0 : index
    %22 = vector.load %arg3[%c0_7, %c0_8] : memref<1x32xf32, #tpu.memory_space<vmem>>, vector<1x32xf32>
    %23 = vector.broadcast %22 : vector<1x32xf32> to vector<16x32xf32>
    %24 = arith.addf %21, %23 : vector<16x32xf32>
    %c0_9 = arith.constant 0 : index
    %c0_10 = arith.constant 0 : index
    %25 = vector.load %arg4[%c0_9, %c0_10] : memref<16x32xf32, #tpu.memory_space<vmem>>, vector<16x32xf32>
    tpu.vector_store %arg4[%c0_9, %c0_10], %24 {strides = array<i32>} : memref<16x32xf32, #tpu.memory_space<vmem>>, vector<16x32xf32>,
    return
  }
  func.func @transform_0(%arg0: i32) -> (i32, i32) {
    %c0_i32 = arith.constant 0 : i32
    %c0_i32_0 = arith.constant 0 : i32
    return %arg0, %c0_i32 : i32, i32
  }
  func.func @transform_1(%arg0: i32) -> (i32, i32) {
    %c0_i32 = arith.constant 0 : i32
    %c0_i32_0 = arith.constant 0 : i32
    %c0_i32_1 = arith.constant 0 : i32
    return %c0_i32, %c0_i32_0 : i32, i32
  }
  func.func @transform_2(%arg0: i32) -> (i32, i32) {
    %c0_i32 = arith.constant 0 : i32
    %c0_i32_0 = arith.constant 0 : i32
    %c0_i32_1 = arith.constant 0 : i32
    return %c0_i32, %c0_i32_0 : i32, i32
  }
  func.func @transform_3(%arg0: i32) -> (i32, i32) {
    %c0_i32 = arith.constant 0 : i32
    %c0_i32_0 = arith.constant 0 : i32
    return %arg0, %c0_i32 : i32, i32
  }
}

</mosaic_0001>

<bundles_post_ra>
// kernel: tpu_custom_call.1
= control target key start
LH: loop header
LB: loop body
LE: loop exit
PB: predicated region body
PF: predicated region fallthrough
CT: control target
= control target key end

     0   :  { %8 = vsyncpa [#allocation3], 0  ;;  %s275_s0 = inlined_call_operand.hbm [shape: f32[16,32], index: 0, kind: input, shape index: {}]   ;;  %s276_s1 = inlined_call_operand.hbm [shape: f32[1,32], index: 1, kind: input, shape index: {}]   ;;  %s277_s2 = inlined_call_operand.vmem [shape: f32[1,32], index: 2, kind: input, shape index: {}]   ;;  %s278_s3 = inlined_call_operand.hbm [shape: f32[16,32], index: 3, kind: output, shape index: {}]  }
   0x1   :  { %9 = vsyncpa [#allocation6], 0 }
   0x2   :  { %10 = vsyncpa [#allocation4], 0  ;;  %s15_s14 = sshll.u32 %s275_s0, 4  ;;  %s225_s15 = smov [#allocation2]   ;;  %s16_s14 = int_to_ptr.hbm [resolvable:$true] %s15_s14 }
   0x3   :  { %s17_s16 = sshll.u32 %s225_s15, 4  ;;  %s29_s19 = sshll.u32 %s276_s1, 4  ;;  %s18_s16 = int_to_ptr.vmem [resolvable:$true] %s17_s16  ;;  %s30_s19 = int_to_ptr.hbm [resolvable:$true] %s29_s19 }
   0x4   :  { %s226_s20 = smov 128   ;;  %s227_s21 = smov 8  }
   0x5   :  { %23 = dma.hbm_to_vmem [thread:$0]  %s16_s14, 256, %s18_s16, [#allocation3], %s226_s20, %s226_s20, %s227_s21  }
   0x6   :  { %s228_s22 = smov [#allocation5]  }
   0x7   :  { %s31_s23 = sshll.u32 %s228_s22, 4  ;;  %s32_s23 = int_to_ptr.vmem [resolvable:$true] %s31_s23 }
   0x8   :  { %34 = dma.hbm_to_vmem [thread:$0]  %s30_s19, 16, %s32_s23, [#allocation6]  }
   0x9   :  { %219 = dma.done.wait [#allocation3], 256  }
   0xa   :  { %220 = vsyncadd [#allocation3], 4294967040 }
   0xb   :  { %221 = dma.done.wait [#allocation6], 16  }
   0xc   :  { %222 = vsyncadd [#allocation6], 4294967280  ;;  %vm47_vm0 = vcmask 261120   ;;  %v45_v0 = vld [vmem:[#allocation2] sm:$0xff]  ;;  %v46_v2 = vld [vmem:[#allocation2 + $0x8] sm:$0xff]  ;;  %v229_v4 = vmov 32.0  }
   0xd   :  { %v48_v1 = vsel %vm47_vm0, %v45_v0, 0.0  ;;  %v51_v3 = vsel %vm47_vm0, %v46_v2, 0.0  ;;  %141 = vrcp.f32 %v229_v4  ;;  %v139_v35 = vld [vmem:[#allocation5] ss:$0 sm:$0xff]  ;;  %v140_v39 = vld [vmem:[%s277_s2] ss:$0 sm:$0xff] }
   0xe   :  { %49 = vadd.xlane.f32.xlu0 %v48_v1  ;;  %s230_s24 = smov [#allocation7]   ;;  %s119_s28 = sshll.u32 %s278_s3, 4  ;;  %s120_s28 = int_to_ptr.hbm [resolvable:$true] %s119_s28 }
   0xf   :  { %s117_s25 = sshll.u32 %s230_s24, 4  ;;  %s118_s25 = int_to_ptr.vmem [resolvable:$true] %s117_s25 }
  0x13   :  { %v142_v5 = vpop.eup %141 }
  0x14   :  { %v55_v6 = vmul.f32 32.0, %v142_v5  ;;  %vm59_vm1 = vweird.f32 %v142_v5 }
  0x16   :  { %52 = vadd.xlane.f32.xlu0 %v51_v3  ;;  %v56_v7 = vsub.f32 1.0, %v55_v6 }
  0x18   :  { %v57_v8 = vmul.f32 %v142_v5, %v56_v7 }
  0x1a   :  { %v58_v9 = vadd.f32 %v142_v5, %v57_v8 }
  0x1c   :  { %v60_v10 = vsel %vm59_vm1, %v142_v5, %v58_v9 }
  0x81   :  { %v50_v11 = vpop.xlane.xlu0 %49 }
  0x82   :  { %v61_v12 = vmul.f32 %v60_v10, %v50_v11 }
  0x84   :  { %v63_v13 = vsub.f32 %v45_v0, %v61_v12 }
  0x86   :  { %v65_v14 = vmul.f32 %v63_v13, %v63_v13 }
  0x88   :  { %v67_v15 = vsel %vm47_vm0, %v65_v14, 0.0 }
  0x89   :  { %68 = vadd.xlane.f32.xlu1 %v67_v15  ;;  %v53_v16 = vpop.xlane.xlu0 %52 }
  0x8a   :  { %v62_v17 = vmul.f32 %v60_v10, %v53_v16 }
  0x8c   :  { %v64_v18 = vsub.f32 %v46_v2, %v62_v17 }
  0x8e   :  { %v66_v19 = vmul.f32 %v64_v18, %v64_v18 }
  0x90   :  { %v70_v20 = vsel %vm47_vm0, %v66_v19, 0.0 }
  0x91   :  { %71 = vadd.xlane.f32.xlu1 %v70_v20 }
  0xfc   :  { %v69_v21 = vpop.xlane.xlu1 %68 }
  0xfd   :  { %v73_v22 = vmul.f32 %v69_v21, %v60_v10 }
  0xff   :  { %v75_v23 = vadd.f32 1e-05, %v73_v22 }
 0x101   :  { %143 = vrsqrt.f32 %v75_v23  ;;  %vm83_vm3 = vweird.f32 %v75_v23 }
 0x104   :  { %v72_v24 = vpop.xlane.xlu1 %71 }
 0x105   :  { %v74_v25 = vmul.f32 %v72_v24, %v60_v10 }
 0x107   :  { %v144_v26 = vpop.eup %143  ;;  %v76_v27 = vadd.f32 1e-05, %v74_v25 }
 0x108   :  { %v78_v28 = vmul.f32 %v144_v26, %v75_v23  ;;  %vm84_vm2 = vweird.f32 %v144_v26 }
 0x109   :  { %145 = vrsqrt.f32 %v76_v27  ;;  %vm85_vm4 = vmor %vm83_vm3, %vm84_vm2  ;;  %vm93_vm6 = vweird.f32 %v76_v27 }
 0x10a   :  { %v79_v29 = vmul.f32 %v144_v26, %v78_v28 }
 0x10c   :  { %v80_v30 = vmul.f32 0.5, %v79_v29 }
 0x10e   :  { %v81_v31 = vsub.f32 1.5, %v80_v30 }
 0x10f   :  { %v146_v32 = vpop.eup %145 }
 0x110   :  { %v82_v33 = vmul.f32 %v144_v26, %v81_v31  ;;  %v88_v34 = vmul.f32 %v146_v32, %v76_v27  ;;  %vm94_vm5 = vweird.f32 %v146_v32 }
 0x111   :  { %vm95_vm7 = vmor %vm93_vm6, %vm94_vm5 }
 0x112   :  { %v86_v36 = vsel %vm85_vm4, %v144_v26, %v82_v33  ;;  %v89_v37 = vmul.f32 %v146_v32, %v88_v34 }
 0x113   :  { %v97_v38 = vmul.f32 %v86_v36, %v63_v13 }
 0x114   :  { %v90_v40 = vmul.f32 0.5, %v89_v37 }
 0x115   :  { %v103_v41 = vmul.f32 %v139_v35, %v97_v38 }
 0x116   :  { %v91_v42 = vsub.f32 1.5, %v90_v40 }
 0x117   :  { %v109_v43 = vadd.f32 %v140_v39, %v103_v41 }
 0x118   :  { %v92_v44 = vmul.f32 %v146_v32, %v91_v42 }
 0x119   :  { %111 = vst.msk [vmem:[#allocation7] sm:$0xff] %vm47_vm0, %v109_v43 }
 0x11a   :  { %v96_v45 = vsel %vm95_vm7, %v146_v32, %v92_v44 }
 0x11b   :  { %v98_v46 = vmul.f32 %v96_v45, %v64_v18 }
 0x11d   :  { %v104_v47 = vmul.f32 %v139_v35, %v98_v46 }
 0x11f   :  { %v110_v48 = vadd.f32 %v140_v39, %v104_v47 }
 0x121   :  { %112 = vst.msk [vmem:[#allocation7 + $0x8] sm:$0xff] %vm47_vm0, %v110_v48 }
 0x122   :  { %125 = dma.vmem_to_hbm [thread:$0]  %s118_s25, 256, %s120_s28, [#allocation4], %s226_s20, %s226_s20, %s227_s21  }
 0x123   :  { %223 = dma.done.wait [#allocation4], 256  }
 0x124   :  { %224 = vsyncadd [#allocation4], 4294967040 }
 0x125   :  { %130 = vsyncpa [#allocation3], 1 }
 0x126   :  { %131 = vsyncpa [#allocation6], 1 }
 0x127   :  { %132 = vsyncpa [#allocation4], 1 }

</bundles_post_ra>
